<compile_context>
chip_gen: v7x
topology: tpu7x:2x2x1
jax: 0.10.0
libtpu: 0.0.40
codegen_flags: <defaults>
</compile_context>

<pallas_src>
import functools

import jax
import jax.numpy as jnp
from jax import lax
from jax.experimental import pallas as pl
from jax.experimental.pallas import tpu as pltpu


def _round_up(v, m):
    return (v + m - 1) // m * m


def _pad2(a, rows, cols):
    pr, pc = rows - a.shape[0], cols - a.shape[1]
    if pr or pc:
        a = jnp.pad(a, ((0, pr), (0, pc)))
    return a


def _classic_mlp_kernel(x_ref, w1_ref, b1_ref, w2_ref, b2_ref,
                        gamma_ref, beta_ref, o_ref, acc_ref, *, eps, h_true):
    # Grid: (row tiles, I chunks).  Axis 1 is the reduction over intermediate.
    c = pl.program_id(1)

    @pl.when(c == 0)
    def _():
        acc_ref[...] = jnp.zeros_like(acc_ref)

    # Native-dtype MXU matmuls, f32 accumulation.
    x = x_ref[...]                                            # (tm, Hp), native dtype
    h = jnp.dot(x, w1_ref[...], preferred_element_type=jnp.float32)
    h = jnp.maximum(h + b1_ref[...].astype(jnp.float32), 0.0)  # ReLU, f32
    acc_ref[...] += jnp.dot(h.astype(w2_ref.dtype), w2_ref[...],
                            preferred_element_type=jnp.float32)

    @pl.when(c == pl.num_programs(1) - 1)
    def _():
        y = acc_ref[...] + b2_ref[...].astype(jnp.float32)     # (tm, Hp) f32
        h_pad = y.shape[-1]
        if h_pad == h_true:
            mean = jnp.mean(y, axis=-1, keepdims=True)
            var = jnp.mean((y - mean) * (y - mean), axis=-1, keepdims=True)
        else:
            # hidden was padded to a lane-dense width; mask stats to true H.
            mask = (lax.broadcasted_iota(jnp.int32, (1, h_pad), 1)
                    < h_true).astype(jnp.float32)
            inv_h = 1.0 / float(h_true)
            mean = jnp.sum(y * mask, axis=-1, keepdims=True) * inv_h
            var = jnp.sum(((y - mean) * (y - mean)) * mask,
                          axis=-1, keepdims=True) * inv_h
        y_norm = (y - mean) * lax.rsqrt(var + eps)             # rsqrt -> EUP
        y_norm = (y_norm * gamma_ref[...].astype(jnp.float32)
                  + beta_ref[...].astype(jnp.float32))
        # dropout (eval mode) = identity; residual add fused in-kernel.
        o_ref[...] = (x.astype(jnp.float32) + y_norm).astype(o_ref.dtype)


def classic_mlp_forward(x, w1, b1, w2, b2, gamma, beta, *, eps=1e-5,
                        tm=512, ti=512):
    """x: (batch, seq, hidden). Returns same shape/dtype as x."""
    B, S, H = x.shape
    I = w1.shape[1]
    N = B * S
    dtype = x.dtype
    itemsize = jnp.dtype(dtype).itemsize

    # Lane-dense padding of hidden / intermediate dims, row-tile sizing.
    H_pad = _round_up(H, 128)
    I_pad = _round_up(I, 128)
    tm_eff = min(tm, _round_up(N, 8))
    ti_eff = min(ti, I_pad)
    N_pad = _round_up(N, tm_eff)
    I_pad = _round_up(I_pad, ti_eff)

    x2 = _pad2(x.reshape(N, H), N_pad, H_pad)
    w1p = _pad2(w1, H_pad, I_pad)
    w2p = _pad2(w2, I_pad, H_pad)
    b1p = _pad2(b1.reshape(1, I), 1, I_pad)
    b2p = _pad2(b2.reshape(1, H), 1, H_pad)
    gp = _pad2(gamma.reshape(1, H), 1, H_pad)
    bp = _pad2(beta.reshape(1, H), 1, H_pad)

    grid = (N_pad // tm_eff, I_pad // ti_eff)

    # VMEM budget derived from the actual tiles (double buffers included),
    # capped at 64 MiB so it stays safe on v7x's smaller physical VMEM.
    vmem_need = (
        2 * 2 * tm_eff * H_pad * itemsize        # x + out tiles, double-buffered
        + 2 * H_pad * ti_eff * itemsize          # w1 chunk, double-buffered
        + 2 * ti_eff * H_pad * itemsize          # w2 chunk, double-buffered
        + 2 * (ti_eff + 3 * H_pad) * itemsize    # b1/b2/gamma/beta
        + tm_eff * H_pad * 4                     # f32 accumulator scratch
    )
    vmem_limit = min(max(int(vmem_need * 1.5), 8 << 20), 64 << 20)

    cost = pl.CostEstimate(
        flops=4 * N * H * I,                       # two matmuls, 2 flops/MAC
        transcendentals=N,                         # one rsqrt per row
        bytes_accessed=(2 * N * H + 2 * H * I) * itemsize,
    )

    out = pl.pallas_call(
        functools.partial(_classic_mlp_kernel, eps=eps, h_true=H),
        out_shape=jax.ShapeDtypeStruct((N_pad, H_pad), dtype),
        grid_spec=pltpu.PrefetchScalarGridSpec(
            num_scalar_prefetch=0,
            grid=grid,
            in_specs=[
                pl.BlockSpec((tm_eff, H_pad), lambda i, c: (i, 0)),   # x rows
                pl.BlockSpec((H_pad, ti_eff), lambda i, c: (0, c)),   # w1 chunk
                pl.BlockSpec((1, ti_eff), lambda i, c: (0, c)),       # b1 chunk
                pl.BlockSpec((ti_eff, H_pad), lambda i, c: (c, 0)),   # w2 chunk
                pl.BlockSpec((1, H_pad), lambda i, c: (0, 0)),        # b2
                pl.BlockSpec((1, H_pad), lambda i, c: (0, 0)),        # gamma
                pl.BlockSpec((1, H_pad), lambda i, c: (0, 0)),        # beta
            ],
            out_specs=pl.BlockSpec((tm_eff, H_pad), lambda i, c: (i, 0)),
            scratch_shapes=[pltpu.VMEM((tm_eff, H_pad), jnp.float32)],
        ),
        compiler_params=pltpu.CompilerParams(
            dimension_semantics=("parallel", "arbitrary"),
            vmem_limit_bytes=vmem_limit,
        ),
        cost_estimate=cost,
    )(x2, w1p, b1p, w2p, b2p, gp, bp)

    return out[:N, :H].reshape(B, S, H)


def _reference(x, w1, b1, w2, b2, gamma, beta, eps=1e-5):
    xf = x.astype(jnp.float32)
    y = (jnp.maximum(xf @ w1.astype(jnp.float32) + b1.astype(jnp.float32), 0.0)
         @ w2.astype(jnp.float32) + b2.astype(jnp.float32))
    mean = jnp.mean(y, -1, keepdims=True)
    var = jnp.mean((y - mean) ** 2, -1, keepdims=True)
    yn = ((y - mean) * jax.lax.rsqrt(var + eps) * gamma.astype(jnp.float32)
          + beta.astype(jnp.float32))
    return (xf + yn).astype(x.dtype)


def _make_params(key, H, I, dtype):
    k1, k2, k3, k4 = jax.random.split(key, 4)
    lim1 = 1.0 / (H ** 0.5)
    lim2 = 1.0 / (I ** 0.5)
    w1 = jax.random.uniform(k1, (H, I), minval=-lim1, maxval=lim1,
                            dtype=jnp.float32).astype(dtype)
    b1 = jax.random.uniform(k2, (I,), minval=-lim1, maxval=lim1,
                            dtype=jnp.float32).astype(dtype)
    w2 = jax.random.uniform(k3, (I, H), minval=-lim2, maxval=lim2,
                            dtype=jnp.float32).astype(dtype)
    b2 = jax.random.uniform(k4, (H,), minval=-lim2, maxval=lim2,
                            dtype=jnp.float32).astype(dtype)
    gamma = jnp.ones((H,), dtype)
    beta = jnp.zeros((H,), dtype)
    return w1, b1, w2, b2, gamma, beta


def _run_case(key, B, S, H, I, dtype, atol, rtol):
    kx, kp = jax.random.split(key)
    x = jax.random.normal(kx, (B, S, H), dtype=jnp.float32).astype(dtype)
    params = _make_params(kp, H, I, dtype)

    out = classic_mlp_forward(x, *params)
    out = jax.block_until_ready(out)
    ref = _reference(x, *params)

    assert out.shape == x.shape and out.dtype == x.dtype
    assert jnp.allclose(out.astype(jnp.float32), ref.astype(jnp.float32),
                        atol=atol, rtol=rtol), \
        f"mismatch vs reference ({B},{S},{H},{I},{dtype})"


if __name__ == "__main__":
    key = jax.random.PRNGKey(0)
    k0, k1, k2 = jax.random.split(key, 3)

    # Toy config matching the module spec (hidden=32, intermediate=64); the
    # wrapper pads hidden/intermediate to lane-dense widths internally.
    _run_case(k0, B=2, S=8, H=32, I=64, dtype=jnp.float32,
              atol=1e-5, rtol=1e-5)

    # Lane-aligned config exercising the (8,128) tiling paths, multi-step grid
    # on both the parallel row axis and the arbitrary I-reduction axis.
    _run_case(k1, B=8, S=128, H=256, I=1024, dtype=jnp.float32,
              atol=1e-4, rtol=1e-4)

    # Native-bf16 MXU path (f32 accumulation keeps it close to the reference).
    _run_case(k2, B=4, S=128, H=128, I=512, dtype=jnp.bfloat16,
              atol=2e-2, rtol=2e-2)

    print("KERNEL_OK")
</pallas_src>

<mosaic_0001>
module attributes {stable_mosaic.version = 11 : i64} {
  func.func @_classic_mlp_kernel(%arg0: i32, %arg1: i32, %arg2: memref<16x128xf32, #tpu.memory_space<vmem>>, %arg3: memref<128x128xf32, #tpu.memory_space<vmem>>, %arg4: memref<1x128xf32, #tpu.memory_space<vmem>>, %arg5: memref<128x128xf32, #tpu.memory_space<vmem>>, %arg6: memref<1x128xf32, #tpu.memory_space<vmem>>, %arg7: memref<1x128xf32, #tpu.memory_space<vmem>>, %arg8: memref<1x128xf32, #tpu.memory_space<vmem>>, %arg9: memref<16x128xf32, #tpu.memory_space<vmem>>, %arg10: memref<16x128xf32, #tpu.memory_space<vmem>>) attributes {dimension_semantics = [#tpu.dimension_semantics<parallel>, #tpu.dimension_semantics<arbitrary>], iteration_bounds = array<i64: 1, 1>, scalar_prefetch = 0 : i64, scratch_operands = 1 : i64, tpu.core_type = #tpu.core_type<tc>, window_params = [{transform_indices = @transform_0, window_bounds = array<i64: 16, 128>}, {transform_indices = @transform_1, window_bounds = array<i64: 128, 128>}, {transform_indices = @transform_2, window_bounds = array<i64: 1, 128>}, {transform_indices = @transform_3, window_bounds = array<i64: 128, 128>}, {pipeline_mode = #tpu.pipeline_mode<synchronous>, transform_indices = @transform_4, window_bounds = array<i64: 1, 128>}, {pipeline_mode = #tpu.pipeline_mode<synchronous>, transform_indices = @transform_5, window_bounds = array<i64: 1, 128>}, {pipeline_mode = #tpu.pipeline_mode<synchronous>, transform_indices = @transform_6, window_bounds = array<i64: 1, 128>}, {transform_indices = @transform_7, window_bounds = array<i64: 16, 128>}]} {
    %c0_i32 = arith.constant 0 : i32
    %0 = arith.cmpi eq, %arg1, %c0_i32 : i32
    %1 = arith.extui %0 : i1 to i32
    %c0_i32_0 = arith.constant 0 : i32
    %2 = arith.cmpi ne, %1, %c0_i32_0 : i32
    scf.if %2 {
      %cst_16 = arith.constant 0.000000e+00 : f32
      %19 = vector.broadcast %cst_16 : f32 to vector<16x128xf32>
      %c0_17 = arith.constant 0 : index
      %c0_18 = arith.constant 0 : index
      %20 = vector.load %arg10[%c0_17, %c0_18] : memref<16x128xf32, #tpu.memory_space<vmem>>, vector<16x128xf32>
      tpu.vector_store %arg10[%c0_17, %c0_18], %19 {strides = array<i32>} : memref<16x128xf32, #tpu.memory_space<vmem>>, vector<16x128xf32>,
    } else {
    }
    %c0 = arith.constant 0 : index
    %c0_1 = arith.constant 0 : index
    %3 = vector.load %arg2[%c0, %c0_1] : memref<16x128xf32, #tpu.memory_space<vmem>>, vector<16x128xf32>
    %c0_2 = arith.constant 0 : index
    %c0_3 = arith.constant 0 : index
    %4 = vector.load %arg3[%c0_2, %c0_3] : memref<128x128xf32, #tpu.memory_space<vmem>>, vector<128x128xf32>
    %cst = arith.constant dense<0.000000e+00> : vector<16x128xf32>
    %5 = tpu.matmul %3, %4, %cst {dimension_numbers = #tpu.dot_dimension_numbers<[1], [0], [0], [1], [0, 0, 1, 1], [], []>} : vector<16x128xf32>, vector<128x128xf32>, vector<16x128xf32> -> vector<16x128xf32>
    %c0_4 = arith.constant 0 : index
    %c0_5 = arith.constant 0 : index
    %6 = vector.load %arg4[%c0_4, %c0_5] : memref<1x128xf32, #tpu.memory_space<vmem>>, vector<1x128xf32>
    %7 = vector.broadcast %6 : vector<1x128xf32> to vector<16x128xf32>
    %8 = arith.addf %5, %7 : vector<16x128xf32>
    %cst_6 = arith.constant 0.000000e+00 : f32
    %9 = vector.broadcast %cst_6 : f32 to vector<16x128xf32>
    %10 = arith.maximumf %8, %9 : vector<16x128xf32>
    %c0_7 = arith.constant 0 : index
    %c0_8 = arith.constant 0 : index
    %11 = vector.load %arg10[%c0_7, %c0_8] : memref<16x128xf32, #tpu.memory_space<vmem>>, vector<16x128xf32>
    %c0_9 = arith.constant 0 : index
    %c0_10 = arith.constant 0 : index
    %12 = vector.load %arg5[%c0_9, %c0_10] : memref<128x128xf32, #tpu.memory_space<vmem>>, vector<128x128xf32>
    %cst_11 = arith.constant dense<0.000000e+00> : vector<16x128xf32>
    %13 = tpu.matmul %10, %12, %cst_11 {dimension_numbers = #tpu.dot_dimension_numbers<[1], [0], [0], [1], [0, 0, 1, 1], [], []>} : vector<16x128xf32>, vector<128x128xf32>, vector<16x128xf32> -> vector<16x128xf32>
    %14 = arith.addf %11, %13 : vector<16x128xf32>
    %c0_12 = arith.constant 0 : index
    %c0_13 = arith.constant 0 : index
    %15 = vector.load %arg10[%c0_12, %c0_13] : memref<16x128xf32, #tpu.memory_space<vmem>>, vector<16x128xf32>
    tpu.vector_store %arg10[%c0_12, %c0_13], %14 {strides = array<i32>} : memref<16x128xf32, #tpu.memory_space<vmem>>, vector<16x128xf32>,
    %c0_i32_14 = arith.constant 0 : i32
    %16 = arith.cmpi eq, %arg1, %c0_i32_14 : i32
    %17 = arith.extui %16 : i1 to i32
    %c0_i32_15 = arith.constant 0 : i32
    %18 = arith.cmpi ne, %17, %c0_i32_15 : i32
    scf.if %18 {
      %c0_16 = arith.constant 0 : index
      %c0_17 = arith.constant 0 : index
      %19 = vector.load %arg10[%c0_16, %c0_17] : memref<16x128xf32, #tpu.memory_space<vmem>>, vector<16x128xf32>
      %c0_18 = arith.constant 0 : index
      %c0_19 = arith.constant 0 : index
      %20 = vector.load %arg6[%c0_18, %c0_19] : memref<1x128xf32, #tpu.memory_space<vmem>>, vector<1x128xf32>
      %21 = vector.broadcast %20 : vector<1x128xf32> to vector<16x128xf32>
      %22 = arith.addf %19, %21 : vector<16x128xf32>
      %23 = tpu.iota {dimensions = array<i32: 1>} : vector<1x128xi32>
      %c32_i32 = arith.constant 32 : i32
      %24 = vector.broadcast %c32_i32 : i32 to vector<1x128xi32>
      %25 = arith.cmpi slt, %23, %24 : vector<1x128xi32>
      %26 = arith.extui %25 : vector<1x128xi1> to vector<1x128xi32>
      %27 = arith.sitofp %26 : vector<1x128xi32> to vector<1x128xf32>
      %28 = vector.broadcast %27 : vector<1x128xf32> to vector<16x128xf32>
      %29 = arith.mulf %22, %28 : vector<16x128xf32>
      %cst_20 = arith.constant dense<0.000000e+00> : vector<16xf32>
      %30 = vector.multi_reduction <add>, %29, %cst_20 [1] : vector<16x128xf32> to vector<16xf32>
      %31 = vector.shape_cast %30 : vector<16xf32> to vector<16x1xf32>
      %cst_21 = arith.constant 3.125000e-02 : f32
      %32 = vector.broadcast %cst_21 : f32 to vector<16x1xf32>
      %33 = arith.mulf %31, %32 : vector<16x1xf32>
      %34 = vector.broadcast %33 : vector<16x1xf32> to vector<16x128xf32>
      %35 = arith.subf %22, %34 : vector<16x128xf32>
      %36 = vector.broadcast %33 : vector<16x1xf32> to vector<16x128xf32>
      %37 = arith.subf %22, %36 : vector<16x128xf32>
      %38 = arith.mulf %35, %37 : vector<16x128xf32>
      %39 = vector.broadcast %27 : vector<1x128xf32> to vector<16x128xf32>
      %40 = arith.mulf %38, %39 : vector<16x128xf32>
      %cst_22 = arith.constant dense<0.000000e+00> : vector<16xf32>
      %41 = vector.multi_reduction <add>, %40, %cst_22 [1] : vector<16x128xf32> to vector<16xf32>
      %42 = vector.shape_cast %41 : vector<16xf32> to vector<16x1xf32>
      %cst_23 = arith.constant 3.125000e-02 : f32
      %43 = vector.broadcast %cst_23 : f32 to vector<16x1xf32>
      %44 = arith.mulf %42, %43 : vector<16x1xf32>
      %45 = vector.broadcast %33 : vector<16x1xf32> to vector<16x128xf32>
      %46 = arith.subf %22, %45 : vector<16x128xf32>
      %cst_24 = arith.constant 9.99999974E-6 : f32
      %47 = vector.broadcast %cst_24 : f32 to vector<16x1xf32>
      %48 = arith.addf %44, %47 : vector<16x1xf32>
      %49 = math.rsqrt %48 : vector<16x1xf32>
      %50 = vector.broadcast %49 : vector<16x1xf32> to vector<16x128xf32>
      %51 = arith.mulf %46, %50 : vector<16x128xf32>
      %c0_25 = arith.constant 0 : index
      %c0_26 = arith.constant 0 : index
      %52 = vector.load %arg7[%c0_25, %c0_26] : memref<1x128xf32, #tpu.memory_space<vmem>>, vector<1x128xf32>
      %53 = vector.broadcast %52 : vector<1x128xf32> to vector<16x128xf32>
      %54 = arith.mulf %51, %53 : vector<16x128xf32>
      %c0_27 = arith.constant 0 : index
      %c0_28 = arith.constant 0 : index
      %55 = vector.load %arg8[%c0_27, %c0_28] : memref<1x128xf32, #tpu.memory_space<vmem>>, vector<1x128xf32>
      %56 = vector.broadcast %55 : vector<1x128xf32> to vector<16x128xf32>
      %57 = arith.addf %54, %56 : vector<16x128xf32>
      %58 = arith.addf %3, %57 : vector<16x128xf32>
      %c0_29 = arith.constant 0 : index
      %c0_30 = arith.constant 0 : index
      %59 = vector.load %arg9[%c0_29, %c0_30] : memref<16x128xf32, #tpu.memory_space<vmem>>, vector<16x128xf32>
      tpu.vector_store %arg9[%c0_29, %c0_30], %58 {strides = array<i32>} : memref<16x128xf32, #tpu.memory_space<vmem>>, vector<16x128xf32>,
    } else {
    }
    return
  }
  func.func @transform_0(%arg0: i32, %arg1: i32) -> (i32, i32) {
    %c0_i32 = arith.constant 0 : i32
    %c0_i32_0 = arith.constant 0 : i32
    return %arg0, %c0_i32 : i32, i32
  }
  func.func @transform_1(%arg0: i32, %arg1: i32) -> (i32, i32) {
    %c0_i32 = arith.constant 0 : i32
    %c0_i32_0 = arith.constant 0 : i32
    return %c0_i32, %arg1 : i32, i32
  }
  func.func @transform_2(%arg0: i32, %arg1: i32) -> (i32, i32) {
    %c0_i32 = arith.constant 0 : i32
    %c0_i32_0 = arith.constant 0 : i32
    return %c0_i32, %arg1 : i32, i32
  }
  func.func @transform_3(%arg0: i32, %arg1: i32) -> (i32, i32) {
    %c0_i32 = arith.constant 0 : i32
    %c0_i32_0 = arith.constant 0 : i32
    return %arg1, %c0_i32 : i32, i32
  }
  func.func @transform_4(%arg0: i32, %arg1: i32) -> (i32, i32) {
    %c0_i32 = arith.constant 0 : i32
    %c0_i32_0 = arith.constant 0 : i32
    %c0_i32_1 = arith.constant 0 : i32
    return %c0_i32, %c0_i32_0 : i32, i32
  }
  func.func @transform_5(%arg0: i32, %arg1: i32) -> (i32, i32) {
    %c0_i32 = arith.constant 0 : i32
    %c0_i32_0 = arith.constant 0 : i32
    %c0_i32_1 = arith.constant 0 : i32
    return %c0_i32, %c0_i32_0 : i32, i32
  }
  func.func @transform_6(%arg0: i32, %arg1: i32) -> (i32, i32) {
    %c0_i32 = arith.constant 0 : i32
    %c0_i32_0 = arith.constant 0 : i32
    %c0_i32_1 = arith.constant 0 : i32
    return %c0_i32, %c0_i32_0 : i32, i32
  }
  func.func @transform_7(%arg0: i32, %arg1: i32) -> (i32, i32) {
    %c0_i32 = arith.constant 0 : i32
    %c0_i32_0 = arith.constant 0 : i32
    return %arg0, %c0_i32 : i32, i32
  }
}

</mosaic_0001>

<bundles_post_ra>
// kernel: tpu_custom_call.1
= control target key start
LH: loop header
LB: loop body
LE: loop exit
PB: predicated region body
PF: predicated region fallthrough
CT: control target
= control target key end

     0   :  { %12 = vsyncpa [#allocation4], 0  ;;  %s772_s0 = inlined_call_operand.hbm [shape: f32[16,128], index: 0, kind: input, shape index: {}]   ;;  %s773_s1 = inlined_call_operand.hbm [shape: f32[128,128], index: 1, kind: input, shape index: {}]   ;;  %s774_s2 = inlined_call_operand.vmem [shape: f32[1,128], index: 2, kind: input, shape index: {}]   ;;  %s775_s3 = inlined_call_operand.hbm [shape: f32[128,128], index: 3, kind: input, shape index: {}]   ;;  %s776_s4 = inlined_call_operand.vmem [shape: f32[1,128], index: 4, kind: input, shape index: {}]   ;;  %s777_s5 = inlined_call_operand.vmem [shape: f32[1,128], index: 5, kind: input, shape index: {}]   ;;  %s778_s6 = inlined_call_operand.vmem [shape: f32[1,128], index: 6, kind: input, shape index: {}]   ;;  %s779_s7 = inlined_call_operand.hbm [shape: f32[16,128], index: 7, kind: output, shape index: {}]  }
   0x1   :  { %13 = vsyncpa [#allocation7], 0 }
   0x2   :  { %14 = vsyncpa [#allocation5], 0  ;;  %s638_s24 = smov [#allocation6]   ;;  %s639_s26 = smov [#allocation3]  }
   0x3   :  { %s32_s25 = sshll.u32 %s638_s24, 4  ;;  %s20_s27 = sshll.u32 %s639_s26, 4  ;;  %s33_s25 = int_to_ptr.vmem [resolvable:$true] %s32_s25  ;;  %s685_s27 = int_to_ptr.vmem [resolvable:$true] %s20_s27 }
   0x4   :  { %s544_s30 = scalar_lea.hbm %s773_s1, 2048 }
   0x5   :  { %p545_p0 = scmp.ne.s32.totalorder %s773_s1, %s544_s30  ;;  %p548_p1 = scmp.lt.u32.totalorder %s544_s30, %s773_s1 }
   0x7   :  { %p550_p2 = pnand %p548_p1, %p545_p0 }
   0x9   :  { %553 = shalt.err (!%p550_p2)
}
   0xa   :  { %s554_s12 = scalar_lea.vmem %s33_s25, 2048  ;;  %p559_p4 = scmp.lt.s32.totalorder %s33_s25, %s33_s25 }
   0xb   :  { %p555_p3 = scmp.ne.s32.totalorder %s33_s25, %s554_s12  ;;  %p560_p5 = scmp.lt.s32.totalorder %s554_s12, %s554_s12 }
   0xd   :  { %p561_p6 = por %p560_p5, %p559_p4 }
   0xf   :  { %p562_p7 = pnand %p561_p6, %p555_p3 }
  0x11   :  { %565 = shalt.err (!%p562_p7)
}
  0x12   :  { %s640_s13 = smov 128   ;;  %s641_s14 = smov 8  }
  0x13   :  { %38 = dma.hbm_to_vmem [thread:$0]  %s773_s1, 2048, %s33_s25, [#allocation7], %s640_s13, %s640_s13, %s641_s14  }
  0x14   :  { %s566_s19 = scalar_lea.hbm %s772_s0, 256 }
  0x15   :  { %p567_p8 = scmp.ne.s32.totalorder %s772_s0, %s566_s19  ;;  %p570_p9 = scmp.lt.u32.totalorder %s566_s19, %s772_s0 }
  0x17   :  { %p572_p10 = pnand %p570_p9, %p567_p8 }
  0x19   :  { %575 = shalt.err (!%p572_p10)
}
  0x1a   :  { %s576_s24 = scalar_lea.vmem %s685_s27, 256  ;;  %p581_p12 = scmp.lt.s32.totalorder %s685_s27, %s685_s27 }
  0x1b   :  { %p577_p11 = scmp.ne.s32.totalorder %s685_s27, %s576_s24  ;;  %p582_p13 = scmp.lt.s32.totalorder %s576_s24, %s576_s24 }
  0x1d   :  { %p583_p0 = por %p582_p13, %p581_p12 }
  0x1f   :  { %p584_p1 = pnand %p583_p0, %p577_p11 }
  0x21   :  { %587 = shalt.err (!%p584_p1)
}
  0x22   :  { %26 = dma.hbm_to_vmem [thread:$0]  %s772_s0, 256, %s685_s27, [#allocation4], %s640_s13, %s640_s13, %s641_s14  }
  0x23   :  { %s642_s26 = smov [#allocation8]   ;;  %s588_s8 = scalar_lea.hbm %s775_s3, 2048 }
  0x24   :  { %s46_s28 = sshll.u32 %s642_s26, 4  ;;  %p589_p2 = scmp.ne.s32.totalorder %s775_s3, %s588_s8  ;;  %s47_s28 = int_to_ptr.vmem [resolvable:$true] %s46_s28 }
  0x25   :  { %p592_p3 = scmp.lt.u32.totalorder %s588_s8, %s775_s3 }
  0x27   :  { %p594_p4 = pnand %p592_p3, %p589_p2 }
  0x29   :  { %597 = shalt.err (!%p594_p4)
}
  0x2a   :  { %s598_s15 = scalar_lea.vmem %s47_s28, 2048  ;;  %p603_p6 = scmp.lt.s32.totalorder %s47_s28, %s47_s28 }
  0x2b   :  { %p599_p5 = scmp.ne.s32.totalorder %s47_s28, %s598_s15  ;;  %p604_p7 = scmp.lt.s32.totalorder %s598_s15, %s598_s15 }
  0x2d   :  { %p605_p8 = por %p604_p7, %p603_p6 }
  0x2f   :  { %p606_p9 = pnand %p605_p8, %p599_p5 }
  0x31   :  { %609 = shalt.err (!%p606_p9)
}
  0x32   :  { %52 = dma.hbm_to_vmem [thread:$0]  %s775_s3, 2048, %s47_s28, [#allocation7], %s640_s13, %s640_s13, %s641_s14  }
  0x33   :  { %632 = dma.done.wait [#allocation4], 256  }
  0x34   :  { %633 = vsyncadd [#allocation4], 4294967040 }
  0x35   :  { %634 = dma.done.wait [#allocation7], 4096  }
  0x36   :  { %635 = vsyncadd [#allocation7], 4294963200  ;;  %v76_v0 = vld [vmem:[#allocation6] sm:$0xff]  ;;  %v77_v1 = vld [vmem:[#allocation6 + $0x8] sm:$0xff]  ;;  %v287_v57 = vlaneseq  ;;  %v643_v62 = vmov 0.0   ;;  %s644_s21 = smov [#allocation9]  }
  0x37   :  { %v78_v2 = vld [vmem:[#allocation6 + $0x10] sm:$0xff]  ;;  %v469_v3 = vpack.c.bf16 %v77_v1, %v76_v0  ;;  %v79_v4 = vld [vmem:[#allocation6 + $0x18] sm:$0xff]  ;;  %v80_v6 = vld [vmem:[#allocation6 + $0x20] sm:$0xff]  ;;  %s345_s22 = sshll.u32 %s644_s21, 4  ;;  %s346_s22 = int_to_ptr.vmem [resolvable:$true] %s345_s22 }
  0x38   :  { %v473_v5 = vpack.c.bf16 %v79_v4, %v78_v2  ;;  %v81_v7 = vld [vmem:[#allocation6 + $0x28] sm:$0xff]  ;;  %v82_v9 = vld [vmem:[#allocation6 + $0x30] sm:$0xff]  ;;  %v83_v10 = vld [vmem:[#allocation6 + $0x38] sm:$0xff]  ;;  %v288_v58 = vand.u32 127, %v287_v57  ;;  %p615_p11 = scmp.lt.s32.totalorder %s346_s22, %s346_s22 }
  0x39   :  { %470 = vmatprep.subr.bf16.mxu0 %v469_v3  ;;  %v477_v8 = vpack.c.bf16 %v81_v7, %v80_v6  ;;  %v737_v11 = vld [vmem:[#allocation3] sm:$0xff]  ;;  %v178_v12 = vld [vmem:[#allocation8] sm:$0xff]  ;;  %v179_v13 = vld [vmem:[#allocation8 + $0x8] sm:$0xff]  ;;  %v481_v20 = vpack.c.bf16 %v83_v10, %v82_v9 }
  0x3a   :  { %472 = vmatpush3.bf16.msra.mxu0 %v469_v3  ;;  %431 = vmatprep.mubr.f32.mxu0 %v737_v11  ;;  %v180_v14 = vld [vmem:[#allocation8 + $0x10] sm:$0xff]  ;;  %v501_v15 = vpack.c.bf16 %v179_v13, %v178_v12  ;;  %v181_v16 = vld [vmem:[#allocation8 + $0x18] sm:$0xff]  ;;  %v182_v18 = vld [vmem:[#allocation8 + $0x20] sm:$0xff]  ;;  %vm289_vm0 = vcmp.lt.s32.totalorder %v288_v58, 32 }
  0x3b   :  { %474 = vmatprep.subr.bf16.mxu0 %v473_v5  ;;  %v505_v17 = vpack.c.bf16 %v181_v16, %v180_v14  ;;  %v183_v19 = vld [vmem:[#allocation8 + $0x28] sm:$0xff]  ;;  %v84_v21 = vld [vmem:[#allocation6 + $0x40] sm:$0xff]  ;;  %v184_v24 = vld [vmem:[#allocation8 + $0x30] sm:$0xff]  ;;  %v360_v63 = vsel %vm289_vm0, 1.0, %v643_v62 }
  0x3c   :  { %502 = vmatprep.subr.bf16.mxu1 %v501_v15  ;;  %v85_v22 = vld [vmem:[#allocation6 + $0x48] sm:$0xff]  ;;  %v509_v23 = vpack.c.bf16 %v183_v19, %v182_v18  ;;  %v185_v25 = vld [vmem:[#allocation8 + $0x38] sm:$0xff]  ;;  %v86_v27 = vld [vmem:[#allocation6 + $0x50] sm:$0xff] }
  0x3d   :  { %504 = vmatpush3.bf16.msra.mxu1 %v501_v15  ;;  %v485_v26 = vpack.c.bf16 %v85_v22, %v84_v21  ;;  %v87_v28 = vld [vmem:[#allocation6 + $0x58] sm:$0xff]  ;;  %v513_v29 = vpack.c.bf16 %v185_v25, %v184_v24  ;;  %v186_v30 = vld [vmem:[#allocation8 + $0x40] sm:$0xff]  ;;  %v187_v31 = vld [vmem:[#allocation8 + $0x48] sm:$0xff] }
  0x3e   :  { %476 = vmatpush3.bf16.msra.mxu0 %v473_v5  ;;  %506 = vmatprep.subr.bf16.mxu1 %v505_v17  ;;  %v489_v32 = vpack.c.bf16 %v87_v28, %v86_v27  ;;  %v88_v33 = vld [vmem:[#allocation6 + $0x60] sm:$0xff]  ;;  %v89_v34 = vld [vmem:[#allocation6 + $0x68] sm:$0xff]  ;;  %v517_v35 = vpack.c.bf16 %v187_v31, %v186_v30  ;;  %v188_v36 = vld [vmem:[#allocation8 + $0x50] sm:$0xff] }
  0x3f   :  { %478 = vmatprep.subr.bf16.mxu0 %v477_v8  ;;  %v189_v37 = vld [vmem:[#allocation8 + $0x58] sm:$0xff]  ;;  %v493_v38 = vpack.c.bf16 %v89_v34, %v88_v33  ;;  %v90_v39 = vld [vmem:[#allocation6 + $0x70] sm:$0xff]  ;;  %v190_v42 = vld [vmem:[#allocation8 + $0x60] sm:$0xff] }
  0x40   :  { %v91_v40 = vld [vmem:[#allocation6 + $0x78] sm:$0xff]  ;;  %v521_v41 = vpack.c.bf16 %v189_v37, %v188_v36  ;;  %v191_v43 = vld [vmem:[#allocation8 + $0x68] sm:$0xff]  ;;  %v192_v47 = vld [vmem:[#allocation8 + $0x70] sm:$0xff] }
  0x41   :  { %508 = vmatpush3.bf16.msra.mxu1 %v505_v17  ;;  %v497_v44 = vpack.c.bf16 %v91_v40, %v90_v39  ;;  %v525_v45 = vpack.c.bf16 %v191_v43, %v190_v42  ;;  %v740_v46 = vld [vmem:[#allocation3 + $0x8] sm:$0xff]  ;;  %v358_v50 = vld [vmem:[%s774_s2] ss:$0 sm:$0xff] }
  0x42   :  { %480 = vmatpush3.bf16.msra.mxu0 %v477_v8  ;;  %510 = vmatprep.subr.bf16.mxu1 %v509_v23  ;;  %v193_v48 = vld [vmem:[#allocation8 + $0x78] sm:$0xff]  ;;  %v359_v59 = vld [vmem:[%s776_s4] ss:$0 sm:$0xff] }
  0x43   :  { %482 = vmatprep.subr.bf16.mxu0 %v481_v20  ;;  %v529_v49 = vpack.c.bf16 %v193_v48, %v192_v47  ;;  %v361_v22 = vld [vmem:[%s777_s5] ss:$0 sm:$0xff]  ;;  %s610_s5 = scalar_lea.vmem %s346_s22, 256 }
  0x44   :  { %v362_v24 = vld [vmem:[%s778_s6] ss:$0 sm:$0xff]  ;;  %p611_p10 = scmp.ne.s32.totalorder %s346_s22, %s610_s5  ;;  %p616_p12 = scmp.lt.s32.totalorder %s610_s5, %s610_s5 }
  0x45   :  { %512 = vmatpush3.bf16.msra.mxu1 %v509_v23 }
  0x46   :  { %484 = vmatpush3.bf16.msra.mxu0 %v481_v20  ;;  %514 = vmatprep.subr.bf16.mxu1 %v513_v29  ;;  %p617_p13 = por %p616_p12, %p615_p11 }
  0x47   :  { %486 = vmatprep.subr.bf16.mxu0 %v485_v26 }
  0x48   :  { %p618_p0 = pnand %p617_p13, %p611_p10 }
  0x49   :  { %516 = vmatpush3.bf16.msra.mxu1 %v513_v29 }
  0x4a   :  { %488 = vmatpush3.bf16.msra.mxu0 %v485_v26  ;;  %518 = vmatprep.subr.bf16.mxu1 %v517_v35 }
  0x4b   :  { %490 = vmatprep.subr.bf16.mxu0 %v489_v32 }
  0x4d   :  { %520 = vmatpush3.bf16.msra.mxu1 %v517_v35 }
  0x4e   :  { %492 = vmatpush3.bf16.msra.mxu0 %v489_v32  ;;  %522 = vmatprep.subr.bf16.mxu1 %v521_v41 }
  0x4f   :  { %494 = vmatprep.subr.bf16.mxu0 %v493_v38 }
  0x51   :  { %524 = vmatpush3.bf16.msra.mxu1 %v521_v41 }
  0x52   :  { %496 = vmatpush3.bf16.msra.mxu0 %v493_v38  ;;  %526 = vmatprep.subr.bf16.mxu1 %v525_v45 }
  0x53   :  { %498 = vmatprep.subr.bf16.mxu0 %v497_v44 }
  0x55   :  { %528 = vmatpush3.bf16.msra.mxu1 %v525_v45 }
  0x56   :  { %500 = vmatpush3.bf16.msra.mxu0 %v497_v44  ;;  %530 = vmatprep.subr.bf16.mxu1 %v529_v49 }
  0x59   :  { %432 = vmatmul.mubr.f32.vlgmr.msra.gmra.mrb[0].mxu0 %v740_v46  ;;  %532 = vmatpush3.bf16.msra.mxu1 %v529_v49 }
 0x12c   :  { %v433_v51 = vpop.f32.mrb[0].mxu0 }
 0x12d   :  { %v171_v52 = vadd.f32 %v433_v51, %v358_v50  ;;  %v165_v53 = vpop.f32.mrb[1].mxu0 }
 0x12e   :  { %v166_v54 = vadd.f32 %v358_v50, %v165_v53 }
 0x12f   :  { %v175_v56 = vmax.f32 %v171_v52, 0.0 }
 0x130   :  { %v174_v55 = vmax.f32 %v166_v54, 0.0 }
 0x132   :  { %466 = vmatprep.mubr.f32.mxu1 %v174_v55 }
 0x133   :  { %467 = vmatmul.mubr.f32.vlgmr.msra.gmra.mrb[0].mxu1 %v175_v56 }
 0x206   :  { %v468_v60 = vpop.f32.mrb[0].mxu1 }
 0x207   :  { %v260_v61 = vpop.f32.mrb[1].mxu1  ;;  %v286_v1 = vadd.f32 %v468_v60, %v359_v59 }
 0x208   :  { %v285_v0 = vadd.f32 %v359_v59, %v260_v61 }
 0x209   :  { %v293_v3 = vmul.f32 %v360_v63, %v286_v1 }
 0x20a   :  { %v292_v2 = vmul.f32 %v360_v63, %v285_v0 }
 0x20c   :  { %294 = vadd.xlane.f32.xlu0 %v292_v2 }
 0x210   :  { %296 = vadd.xlane.f32.xlu0 %v293_v3 }
 0x299   :  { %v295_v4 = vpop.xlane.xlu0 %294 }
 0x29a   :  { %v298_v5 = vmul.f32 0.03125, %v295_v4 }
 0x29c   :  { %v300_v6 = vsub.f32 %v285_v0, %v298_v5 }
 0x29d   :  { %v297_v7 = vpop.xlane.xlu0 %296 }
 0x29e   :  { %v299_v8 = vmul.f32 0.03125, %v297_v7  ;;  %v302_v9 = vmul.f32 %v300_v6, %v300_v6 }
 0x2a0   :  { %v301_v10 = vsub.f32 %v286_v1, %v299_v8  ;;  %v304_v12 = vmul.f32 %v360_v63, %v302_v9 }
 0x2a2   :  { %306 = vadd.xlane.f32.xlu1 %v304_v12  ;;  %v303_v13 = vmul.f32 %v301_v10, %v301_v10 }
 0x2a4   :  { %v305_v14 = vmul.f32 %v360_v63, %v303_v13 }
 0x2a6   :  { %308 = vadd.xlane.f32.xlu1 %v305_v14 }
 0x32f   :  { %v307_v15 = vpop.xlane.xlu1 %306 }
 0x330   :  { %v310_v16 = vmul.f32 0.03125, %v307_v15 }
 0x332   :  { %v312_v17 = vadd.f32 1e-05, %v310_v16 }
 0x333   :  { %v309_v18 = vpop.xlane.xlu1 %308 }
 0x334   :  { %540 = vrsqrt.f32 %v312_v17  ;;  %v311_v19 = vmul.f32 0.03125, %v309_v18 }
 0x336   :  { %v313_v20 = vadd.f32 1e-05, %v311_v19 }
 0x338   :  { %542 = vrsqrt.f32 %v313_v20 }
 0x33e   :  { %v541_v21 = vpop.eup %540 }
 0x33f   :  { %v316_v23 = vmul.f32 %v541_v21, %v300_v6 }
 0x341   :  { %v325_v25 = vmul.f32 %v361_v22, %v316_v23 }
 0x342   :  { %v543_v26 = vpop.eup %542 }
 0x343   :  { %v317_v27 = vmul.f32 %v543_v26, %v301_v10  ;;  %v334_v28 = vadd.f32 %v362_v24, %v325_v25 }
 0x345   :  { %v326_v29 = vmul.f32 %v361_v22, %v317_v27  ;;  %v336_v30 = vadd.f32 %v334_v28, %v737_v11 }
 0x347   :  { %v335_v31 = vadd.f32 %v362_v24, %v326_v29  ;;  %338 = vst [vmem:[#allocation9] sm:$0xff] %v336_v30 }
 0x349   :  { %v337_v32 = vadd.f32 %v335_v31, %v740_v46 }
 0x34b   :  { %339 = vst [vmem:[#allocation9 + $0x8] sm:$0xff] %v337_v32 }
 0x34c   :  { %621 = shalt.err (!%p618_p0)
}
 0x34d   :  { %s622_s24 = scalar_lea.hbm %s779_s7, 256 }
 0x34e   :  { %p623_p1 = scmp.ne.s32.totalorder %s779_s7, %s622_s24  ;;  %p626_p2 = scmp.lt.u32.totalorder %s622_s24, %s779_s7 }
 0x350   :  { %p628_p3 = pnand %p626_p2, %p623_p1 }
 0x352   :  { %631 = shalt.err (!%p628_p3)
}
 0x353   :  { %351 = dma.vmem_to_hbm [thread:$0]  %s346_s22, 256, %s779_s7, [#allocation5], %s640_s13, %s640_s13, %s641_s14  }
 0x354   :  { %636 = dma.done.wait [#allocation5], 256  }
 0x355   :  { %637 = vsyncadd [#allocation5], 4294967040 }
 0x356   :  { %355 = vsyncpa [#allocation4], 1 }
 0x357   :  { %356 = vsyncpa [#allocation7], 1 }
 0x358   :  { %357 = vsyncpa [#allocation5], 1 }

</bundles_post_ra>
